<compile_context>
chip_gen: v7x
topology: tpu7x:2x2x1
jax: 0.10.0
libtpu: 0.0.40
codegen_flags: <defaults>
</compile_context>

<pallas_src>
import jax
import jax.numpy as jnp
from jax.experimental import pallas as pl
from jax.experimental.pallas import tpu as pltpu

D_in = 1
D_out = 1
H = 4
N = 8
H2 = H * 2           # hidden width = 8 (== sublane count, convenient)
P_COLS = 128         # packed-parameter slab lane width (one f32 vreg: [8, 128])
MAX_TILE_N = 1024    # max lanes per grid step (keeps live vregs well under 64)

# Column layout of the packed parameter slab (all f32, 8-lane aligned):
#   [:, 0:1]    W1      ([8, 1], PyTorch [out, in] layout as-is)
#   [:, 8:16]   W2      ([8, 8])
#   [:, 16:24]  W3      ([8, 8])
#   [:, 24]     b1      ([8])
#   [:, 25]     b2
#   [:, 26]     b3
#   [0, 27]     b4      (scalar)
#   [:, 28:29]  W4^T    ([8, 1])
#   rest: zero padding (never read)


def _disc_kernel(x_ref, p_ref, out_ref):
    # x_ref: [1, TILE] (batch on lanes).  p_ref: [8, 128] packed params.
    x = x_ref[...]                       # [1, TILE]

    w1 = p_ref[:, 0:1]                   # [8, 1]
    w2 = p_ref[:, 8:16]                  # [8, 8]
    w3 = p_ref[:, 16:24]                 # [8, 8]
    b1 = p_ref[:, 24:25]                 # [8, 1]
    b2 = p_ref[:, 25:26]                 # [8, 1]
    b3 = p_ref[:, 26:27]                 # [8, 1]
    b4 = p_ref[0:1, 27:28]               # [1, 1]
    w4 = p_ref[:, 28:29]                 # [8, 1]  (W4 transposed)

    # Layer 1 (K=1): outer-product broadcast FMA on the VPU, no MXU.
    h = jnp.tanh(w1 * x + b1)                                    # [8, TILE]

    # Layers 2-3: 8 unrolled VPU broadcast-FMAs each (MXU bypassed; the
    # 8x8 dot would be <0.1% MXU-occupied and serialize on push/pop latency).
    def dense_tanh(w, b, h_in):
        acc = b                                                   # [8, 1]
        for k in range(H2):
            acc = acc + w[:, k:k + 1] * h_in[k:k + 1, :]          # [8, TILE]
        return jnp.tanh(acc)

    h = dense_tanh(w2, b2, h)
    h = dense_tanh(w3, b3, h)

    # Layer 4 (D_out=1): VPU multiply + cross-sublane reduce (XLU), no MXU.
    logits = jnp.sum(w4 * h, axis=0, keepdims=True) + b4          # [1, TILE]

    # sigmoid(z) == 0.5 * tanh(0.5 * z) + 0.5  (keeps transcendental on EUP).
    out_ref[...] = (0.5 * jnp.tanh(0.5 * logits) + 0.5).astype(out_ref.dtype)


def prepare_params(p):
    """One-time packing of PyTorch-layout params into a single [8, 128] slab."""
    slab = jnp.zeros((H2, P_COLS), jnp.float32)
    slab = slab.at[:, 0:1].set(p["w1"].astype(jnp.float32))        # [8, 1]
    slab = slab.at[:, 8:16].set(p["w2"].astype(jnp.float32))       # [8, 8]
    slab = slab.at[:, 16:24].set(p["w3"].astype(jnp.float32))      # [8, 8]
    slab = slab.at[:, 24].set(p["b1"].astype(jnp.float32))
    slab = slab.at[:, 25].set(p["b2"].astype(jnp.float32))
    slab = slab.at[:, 26].set(p["b3"].astype(jnp.float32))
    slab = slab.at[0, 27].set(p["b4"].astype(jnp.float32)[0])
    slab = slab.at[:, 28:29].set(p["w4"].T.astype(jnp.float32))    # [8, 1]
    return slab


def _round_up(n, m):
    return ((n + m - 1) // m) * m


def discriminator_forward(x, packed_params, max_tile_n=MAX_TILE_N):
    """x: [N, D_in] float32.  packed_params: output of prepare_params()."""
    n = x.shape[0]

    # Lane-dense batch tile: multiple of 128, capped so activations stay in vregs.
    tile = min(max_tile_n, _round_up(n, 128))
    n_pad = _round_up(n, tile)

    # Batch-on-lanes layout: [N, 1] -> [1, N] (pure reshape, no data movement),
    # then zero-pad lanes up to the tile boundary (padded lanes are sliced off).
    x_t = x.reshape(D_in, n)
    if n_pad != n:
        x_t = jnp.pad(x_t, ((0, 0), (0, n_pad - n)))

    grid = (pl.cdiv(n_pad, tile),)

    cost = pl.CostEstimate(
        flops=288 * n_pad,                              # 16 + 128 + 128 + 16 per element
        transcendentals=25 * n_pad,                     # 8 + 8 + 8 tanh + 1 sigmoid
        bytes_accessed=2 * 4 * n_pad + H2 * P_COLS * 4,
    )

    out_t = pl.pallas_call(
        _disc_kernel,
        out_shape=jax.ShapeDtypeStruct((D_out, n_pad), jnp.float32),
        grid=grid,
        in_specs=[
            pl.BlockSpec((D_in, tile), lambda i: (0, i)),        # batch tile
            pl.BlockSpec((H2, P_COLS), lambda i: (0, 0)),        # resident param slab
        ],
        out_specs=pl.BlockSpec((D_out, tile), lambda i: (0, i)),
        compiler_params=pltpu.CompilerParams(
            dimension_semantics=("parallel",)),                  # shard tiles across TCs
        cost_estimate=cost,
    )(x_t, packed_params)

    # Back to the PyTorch [N, D_out] convention.
    return out_t[:, :n].reshape(n, D_out)


def init_params(key):
    """Deterministic init mimicking torch.nn.Linear (uniform +-1/sqrt(fan_in))."""
    def linear(key, fan_in, fan_out):
        kw, kb = jax.random.split(key)
        bound = 1.0 / jnp.sqrt(jnp.float32(fan_in))
        w = jax.random.uniform(kw, (fan_out, fan_in), jnp.float32, -bound, bound)
        b = jax.random.uniform(kb, (fan_out,), jnp.float32, -bound, bound)
        return w, b

    k1, k2, k3, k4 = jax.random.split(key, 4)
    w1, b1 = linear(k1, D_in, H2)
    w2, b2 = linear(k2, H2, H2)
    w3, b3 = linear(k3, H2, H2)
    w4, b4 = linear(k4, H2, D_out)
    return {"w1": w1, "b1": b1, "w2": w2, "b2": b2,
            "w3": w3, "b3": b3, "w4": w4, "b4": b4}


def reference_forward(x, p):
    h0 = jnp.tanh(x @ p["w1"].T + p["b1"])
    h1 = jnp.tanh(h0 @ p["w2"].T + p["b2"])
    h2 = jnp.tanh(h1 @ p["w3"].T + p["b3"])
    return jax.nn.sigmoid(h2 @ p["w4"].T + p["b4"])


if __name__ == "__main__":
    key = jax.random.PRNGKey(0)
    kx, kp, kx2 = jax.random.split(key, 3)

    params = init_params(kp)
    packed = prepare_params(params)
    packed = jax.block_until_ready(packed)   # one-time packing, hoisted

    # 1) Module-spec shape: N = 8 (single 128-lane padded tile).
    x = jax.random.normal(kx, (N, D_in), dtype=jnp.float32)
    out = jax.block_until_ready(discriminator_forward(x, packed))
    ref = reference_forward(x, params)
    assert out.shape == (N, D_out), out.shape
    assert jnp.allclose(out, ref, atol=1e-5, rtol=1e-5), (out, ref)

    # 2) Multi-tile batch grid exercise (padding + grid > 1 + parallel axis).
    n_big = 1000
    x_big = jax.random.normal(kx2, (n_big, D_in), dtype=jnp.float32)
    out_big = jax.block_until_ready(
        discriminator_forward(x_big, packed, max_tile_n=256))
    ref_big = reference_forward(x_big, params)
    assert out_big.shape == (n_big, D_out), out_big.shape
    assert jnp.allclose(out_big, ref_big, atol=1e-5, rtol=1e-5)

    print("KERNEL_OK")
</pallas_src>

<mosaic_0001>
module attributes {stable_mosaic.version = 11 : i64} {
  func.func @_disc_kernel(%arg0: i32, %arg1: memref<1x128xf32, #tpu.memory_space<vmem>>, %arg2: memref<8x128xf32, #tpu.memory_space<vmem>>, %arg3: memref<1x128xf32, #tpu.memory_space<vmem>>) attributes {dimension_semantics = [#tpu.dimension_semantics<parallel>], iteration_bounds = array<i64: 1>, scalar_prefetch = 0 : i64, scratch_operands = 0 : i64, tpu.core_type = #tpu.core_type<tc>, window_params = [{transform_indices = @transform_0, window_bounds = array<i64: 1, 128>}, {pipeline_mode = #tpu.pipeline_mode<synchronous>, transform_indices = @transform_1, window_bounds = array<i64: 8, 128>}, {transform_indices = @transform_2, window_bounds = array<i64: 1, 128>}]} {
    %c0 = arith.constant 0 : index
    %c0_0 = arith.constant 0 : index
    %0 = vector.load %arg1[%c0, %c0_0] : memref<1x128xf32, #tpu.memory_space<vmem>>, vector<1x128xf32>
    %c0_1 = arith.constant 0 : index
    %c0_2 = arith.constant 0 : index
    %1 = vector.load %arg2[%c0_1, %c0_2] : memref<8x128xf32, #tpu.memory_space<vmem>>, vector<8x1xf32>
    %c0_3 = arith.constant 0 : index
    %c8 = arith.constant 8 : index
    %2 = vector.load %arg2[%c0_3, %c8] : memref<8x128xf32, #tpu.memory_space<vmem>>, vector<8x8xf32>
    %c0_4 = arith.constant 0 : index
    %c16 = arith.constant 16 : index
    %3 = vector.load %arg2[%c0_4, %c16] : memref<8x128xf32, #tpu.memory_space<vmem>>, vector<8x8xf32>
    %c0_5 = arith.constant 0 : index
    %c24 = arith.constant 24 : index
    %4 = vector.load %arg2[%c0_5, %c24] : memref<8x128xf32, #tpu.memory_space<vmem>>, vector<8x1xf32>
    %c0_6 = arith.constant 0 : index
    %c25 = arith.constant 25 : index
    %5 = vector.load %arg2[%c0_6, %c25] : memref<8x128xf32, #tpu.memory_space<vmem>>, vector<8x1xf32>
    %c0_7 = arith.constant 0 : index
    %c26 = arith.constant 26 : index
    %6 = vector.load %arg2[%c0_7, %c26] : memref<8x128xf32, #tpu.memory_space<vmem>>, vector<8x1xf32>
    %c0_8 = arith.constant 0 : index
    %c27 = arith.constant 27 : index
    %7 = vector.load %arg2[%c0_8, %c27] : memref<8x128xf32, #tpu.memory_space<vmem>>, vector<1x1xf32>
    %c0_9 = arith.constant 0 : index
    %c28 = arith.constant 28 : index
    %8 = vector.load %arg2[%c0_9, %c28] : memref<8x128xf32, #tpu.memory_space<vmem>>, vector<8x1xf32>
    %9 = vector.broadcast %1 : vector<8x1xf32> to vector<8x128xf32>
    %10 = vector.broadcast %0 : vector<1x128xf32> to vector<8x128xf32>
    %11 = arith.mulf %9, %10 : vector<8x128xf32>
    %12 = vector.broadcast %4 : vector<8x1xf32> to vector<8x128xf32>
    %13 = arith.addf %11, %12 : vector<8x128xf32>
    %14 = math.tanh %13 : vector<8x128xf32>
    %15 = vector.extract_strided_slice %2 {offsets = [0, 0], sizes = [8, 1], strides = [1, 1]} : vector<8x8xf32> to vector<8x1xf32>
    %16 = vector.extract_strided_slice %14 {offsets = [0, 0], sizes = [1, 128], strides = [1, 1]} : vector<8x128xf32> to vector<1x128xf32>
    %17 = vector.broadcast %15 : vector<8x1xf32> to vector<8x128xf32>
    %18 = vector.broadcast %16 : vector<1x128xf32> to vector<8x128xf32>
    %19 = arith.mulf %17, %18 : vector<8x128xf32>
    %20 = vector.broadcast %5 : vector<8x1xf32> to vector<8x128xf32>
    %21 = arith.addf %20, %19 : vector<8x128xf32>
    %22 = vector.extract_strided_slice %2 {offsets = [0, 1], sizes = [8, 1], strides = [1, 1]} : vector<8x8xf32> to vector<8x1xf32>
    %23 = vector.extract_strided_slice %14 {offsets = [1, 0], sizes = [1, 128], strides = [1, 1]} : vector<8x128xf32> to vector<1x128xf32>
    %24 = vector.broadcast %22 : vector<8x1xf32> to vector<8x128xf32>
    %25 = vector.broadcast %23 : vector<1x128xf32> to vector<8x128xf32>
    %26 = arith.mulf %24, %25 : vector<8x128xf32>
    %27 = arith.addf %21, %26 : vector<8x128xf32>
    %28 = vector.extract_strided_slice %2 {offsets = [0, 2], sizes = [8, 1], strides = [1, 1]} : vector<8x8xf32> to vector<8x1xf32>
    %29 = vector.extract_strided_slice %14 {offsets = [2, 0], sizes = [1, 128], strides = [1, 1]} : vector<8x128xf32> to vector<1x128xf32>
    %30 = vector.broadcast %28 : vector<8x1xf32> to vector<8x128xf32>
    %31 = vector.broadcast %29 : vector<1x128xf32> to vector<8x128xf32>
    %32 = arith.mulf %30, %31 : vector<8x128xf32>
    %33 = arith.addf %27, %32 : vector<8x128xf32>
    %34 = vector.extract_strided_slice %2 {offsets = [0, 3], sizes = [8, 1], strides = [1, 1]} : vector<8x8xf32> to vector<8x1xf32>
    %35 = vector.extract_strided_slice %14 {offsets = [3, 0], sizes = [1, 128], strides = [1, 1]} : vector<8x128xf32> to vector<1x128xf32>
    %36 = vector.broadcast %34 : vector<8x1xf32> to vector<8x128xf32>
    %37 = vector.broadcast %35 : vector<1x128xf32> to vector<8x128xf32>
    %38 = arith.mulf %36, %37 : vector<8x128xf32>
    %39 = arith.addf %33, %38 : vector<8x128xf32>
    %40 = vector.extract_strided_slice %2 {offsets = [0, 4], sizes = [8, 1], strides = [1, 1]} : vector<8x8xf32> to vector<8x1xf32>
    %41 = vector.extract_strided_slice %14 {offsets = [4, 0], sizes = [1, 128], strides = [1, 1]} : vector<8x128xf32> to vector<1x128xf32>
    %42 = vector.broadcast %40 : vector<8x1xf32> to vector<8x128xf32>
    %43 = vector.broadcast %41 : vector<1x128xf32> to vector<8x128xf32>
    %44 = arith.mulf %42, %43 : vector<8x128xf32>
    %45 = arith.addf %39, %44 : vector<8x128xf32>
    %46 = vector.extract_strided_slice %2 {offsets = [0, 5], sizes = [8, 1], strides = [1, 1]} : vector<8x8xf32> to vector<8x1xf32>
    %47 = vector.extract_strided_slice %14 {offsets = [5, 0], sizes = [1, 128], strides = [1, 1]} : vector<8x128xf32> to vector<1x128xf32>
    %48 = vector.broadcast %46 : vector<8x1xf32> to vector<8x128xf32>
    %49 = vector.broadcast %47 : vector<1x128xf32> to vector<8x128xf32>
    %50 = arith.mulf %48, %49 : vector<8x128xf32>
    %51 = arith.addf %45, %50 : vector<8x128xf32>
    %52 = vector.extract_strided_slice %2 {offsets = [0, 6], sizes = [8, 1], strides = [1, 1]} : vector<8x8xf32> to vector<8x1xf32>
    %53 = vector.extract_strided_slice %14 {offsets = [6, 0], sizes = [1, 128], strides = [1, 1]} : vector<8x128xf32> to vector<1x128xf32>
    %54 = vector.broadcast %52 : vector<8x1xf32> to vector<8x128xf32>
    %55 = vector.broadcast %53 : vector<1x128xf32> to vector<8x128xf32>
    %56 = arith.mulf %54, %55 : vector<8x128xf32>
    %57 = arith.addf %51, %56 : vector<8x128xf32>
    %58 = vector.extract_strided_slice %2 {offsets = [0, 7], sizes = [8, 1], strides = [1, 1]} : vector<8x8xf32> to vector<8x1xf32>
    %59 = vector.extract_strided_slice %14 {offsets = [7, 0], sizes = [1, 128], strides = [1, 1]} : vector<8x128xf32> to vector<1x128xf32>
    %60 = vector.broadcast %58 : vector<8x1xf32> to vector<8x128xf32>
    %61 = vector.broadcast %59 : vector<1x128xf32> to vector<8x128xf32>
    %62 = arith.mulf %60, %61 : vector<8x128xf32>
    %63 = arith.addf %57, %62 : vector<8x128xf32>
    %64 = math.tanh %63 : vector<8x128xf32>
    %65 = vector.extract_strided_slice %3 {offsets = [0, 0], sizes = [8, 1], strides = [1, 1]} : vector<8x8xf32> to vector<8x1xf32>
    %66 = vector.extract_strided_slice %64 {offsets = [0, 0], sizes = [1, 128], strides = [1, 1]} : vector<8x128xf32> to vector<1x128xf32>
    %67 = vector.broadcast %65 : vector<8x1xf32> to vector<8x128xf32>
    %68 = vector.broadcast %66 : vector<1x128xf32> to vector<8x128xf32>
    %69 = arith.mulf %67, %68 : vector<8x128xf32>
    %70 = vector.broadcast %6 : vector<8x1xf32> to vector<8x128xf32>
    %71 = arith.addf %70, %69 : vector<8x128xf32>
    %72 = vector.extract_strided_slice %3 {offsets = [0, 1], sizes = [8, 1], strides = [1, 1]} : vector<8x8xf32> to vector<8x1xf32>
    %73 = vector.extract_strided_slice %64 {offsets = [1, 0], sizes = [1, 128], strides = [1, 1]} : vector<8x128xf32> to vector<1x128xf32>
    %74 = vector.broadcast %72 : vector<8x1xf32> to vector<8x128xf32>
    %75 = vector.broadcast %73 : vector<1x128xf32> to vector<8x128xf32>
    %76 = arith.mulf %74, %75 : vector<8x128xf32>
    %77 = arith.addf %71, %76 : vector<8x128xf32>
    %78 = vector.extract_strided_slice %3 {offsets = [0, 2], sizes = [8, 1], strides = [1, 1]} : vector<8x8xf32> to vector<8x1xf32>
    %79 = vector.extract_strided_slice %64 {offsets = [2, 0], sizes = [1, 128], strides = [1, 1]} : vector<8x128xf32> to vector<1x128xf32>
    %80 = vector.broadcast %78 : vector<8x1xf32> to vector<8x128xf32>
    %81 = vector.broadcast %79 : vector<1x128xf32> to vector<8x128xf32>
    %82 = arith.mulf %80, %81 : vector<8x128xf32>
    %83 = arith.addf %77, %82 : vector<8x128xf32>
    %84 = vector.extract_strided_slice %3 {offsets = [0, 3], sizes = [8, 1], strides = [1, 1]} : vector<8x8xf32> to vector<8x1xf32>
    %85 = vector.extract_strided_slice %64 {offsets = [3, 0], sizes = [1, 128], strides = [1, 1]} : vector<8x128xf32> to vector<1x128xf32>
    %86 = vector.broadcast %84 : vector<8x1xf32> to vector<8x128xf32>
    %87 = vector.broadcast %85 : vector<1x128xf32> to vector<8x128xf32>
    %88 = arith.mulf %86, %87 : vector<8x128xf32>
    %89 = arith.addf %83, %88 : vector<8x128xf32>
    %90 = vector.extract_strided_slice %3 {offsets = [0, 4], sizes = [8, 1], strides = [1, 1]} : vector<8x8xf32> to vector<8x1xf32>
    %91 = vector.extract_strided_slice %64 {offsets = [4, 0], sizes = [1, 128], strides = [1, 1]} : vector<8x128xf32> to vector<1x128xf32>
    %92 = vector.broadcast %90 : vector<8x1xf32> to vector<8x128xf32>
    %93 = vector.broadcast %91 : vector<1x128xf32> to vector<8x128xf32>
    %94 = arith.mulf %92, %93 : vector<8x128xf32>
    %95 = arith.addf %89, %94 : vector<8x128xf32>
    %96 = vector.extract_strided_slice %3 {offsets = [0, 5], sizes = [8, 1], strides = [1, 1]} : vector<8x8xf32> to vector<8x1xf32>
    %97 = vector.extract_strided_slice %64 {offsets = [5, 0], sizes = [1, 128], strides = [1, 1]} : vector<8x128xf32> to vector<1x128xf32>
    %98 = vector.broadcast %96 : vector<8x1xf32> to vector<8x128xf32>
    %99 = vector.broadcast %97 : vector<1x128xf32> to vector<8x128xf32>
    %100 = arith.mulf %98, %99 : vector<8x128xf32>
    %101 = arith.addf %95, %100 : vector<8x128xf32>
    %102 = vector.extract_strided_slice %3 {offsets = [0, 6], sizes = [8, 1], strides = [1, 1]} : vector<8x8xf32> to vector<8x1xf32>
    %103 = vector.extract_strided_slice %64 {offsets = [6, 0], sizes = [1, 128], strides = [1, 1]} : vector<8x128xf32> to vector<1x128xf32>
    %104 = vector.broadcast %102 : vector<8x1xf32> to vector<8x128xf32>
    %105 = vector.broadcast %103 : vector<1x128xf32> to vector<8x128xf32>
    %106 = arith.mulf %104, %105 : vector<8x128xf32>
    %107 = arith.addf %101, %106 : vector<8x128xf32>
    %108 = vector.extract_strided_slice %3 {offsets = [0, 7], sizes = [8, 1], strides = [1, 1]} : vector<8x8xf32> to vector<8x1xf32>
    %109 = vector.extract_strided_slice %64 {offsets = [7, 0], sizes = [1, 128], strides = [1, 1]} : vector<8x128xf32> to vector<1x128xf32>
    %110 = vector.broadcast %108 : vector<8x1xf32> to vector<8x128xf32>
    %111 = vector.broadcast %109 : vector<1x128xf32> to vector<8x128xf32>
    %112 = arith.mulf %110, %111 : vector<8x128xf32>
    %113 = arith.addf %107, %112 : vector<8x128xf32>
    %114 = math.tanh %113 : vector<8x128xf32>
    %115 = vector.broadcast %8 : vector<8x1xf32> to vector<8x128xf32>
    %116 = arith.mulf %115, %114 : vector<8x128xf32>
    %cst = arith.constant dense<0.000000e+00> : vector<128xf32>
    %117 = vector.multi_reduction <add>, %116, %cst [0] : vector<8x128xf32> to vector<128xf32>
    %118 = vector.shape_cast %117 : vector<128xf32> to vector<1x128xf32>
    %119 = vector.broadcast %7 : vector<1x1xf32> to vector<1x128xf32>
    %120 = arith.addf %118, %119 : vector<1x128xf32>
    %cst_10 = arith.constant 5.000000e-01 : f32
    %121 = vector.broadcast %cst_10 : f32 to vector<1x128xf32>
    %122 = arith.mulf %121, %120 : vector<1x128xf32>
    %123 = math.tanh %122 : vector<1x128xf32>
    %cst_11 = arith.constant 5.000000e-01 : f32
    %124 = vector.broadcast %cst_11 : f32 to vector<1x128xf32>
    %125 = arith.mulf %124, %123 : vector<1x128xf32>
    %cst_12 = arith.constant 5.000000e-01 : f32
    %126 = vector.broadcast %cst_12 : f32 to vector<1x128xf32>
    %127 = arith.addf %125, %126 : vector<1x128xf32>
    %c0_13 = arith.constant 0 : index
    %c0_14 = arith.constant 0 : index
    %128 = vector.load %arg3[%c0_13, %c0_14] : memref<1x128xf32, #tpu.memory_space<vmem>>, vector<1x128xf32>
    tpu.vector_store %arg3[%c0_13, %c0_14], %127 {strides = array<i32>} : memref<1x128xf32, #tpu.memory_space<vmem>>, vector<1x128xf32>,
    return
  }
  func.func @transform_0(%arg0: i32) -> (i32, i32) {
    %c0_i32 = arith.constant 0 : i32
    %c0_i32_0 = arith.constant 0 : i32
    return %c0_i32, %arg0 : i32, i32
  }
  func.func @transform_1(%arg0: i32) -> (i32, i32) {
    %c0_i32 = arith.constant 0 : i32
    %c0_i32_0 = arith.constant 0 : i32
    %c0_i32_1 = arith.constant 0 : i32
    return %c0_i32, %c0_i32_0 : i32, i32
  }
  func.func @transform_2(%arg0: i32) -> (i32, i32) {
    %c0_i32 = arith.constant 0 : i32
    %c0_i32_0 = arith.constant 0 : i32
    return %c0_i32, %arg0 : i32, i32
  }
}

</mosaic_0001>

<bundles_post_ra>
// kernel: tpu_custom_call.1
= control target key start
LH: loop header
LB: loop body
LE: loop exit
PB: predicated region body
PF: predicated region fallthrough
CT: control target
= control target key end

     0   :  { %7 = vsyncpa [#allocation3], 0  ;;  %s480_s0 = inlined_call_operand.hbm [shape: f32[1,128], index: 0, kind: input, shape index: {}]   ;;  %s481_s1 = inlined_call_operand.hbm [shape: f32[8,128], index: 1, kind: input, shape index: {}]   ;;  %s482_s2 = inlined_call_operand.hbm [shape: f32[1,128], index: 2, kind: output, shape index: {}]  }
   0x1   :  { %8 = vsyncpa [#allocation6], 0 }
   0x2   :  { %9 = vsyncpa [#allocation4], 0  ;;  %s394_s9 = smov [#allocation2]   ;;  %s395_s11 = smov [#allocation5]  }
   0x3   :  { %s16_s10 = sshll.u32 %s394_s9, 4  ;;  %s26_s12 = sshll.u32 %s395_s11, 4  ;;  %s17_s10 = int_to_ptr.vmem [resolvable:$true] %s16_s10  ;;  %s27_s12 = int_to_ptr.vmem [resolvable:$true] %s26_s12 }
   0x4   :  { %s322_s15 = scalar_lea.hbm %s480_s0, 16 }
   0x5   :  { %p323_p0 = scmp.ne.s32.totalorder %s480_s0, %s322_s15  ;;  %p326_p1 = scmp.lt.u32.totalorder %s322_s15, %s480_s0 }
   0x7   :  { %p328_p2 = pnand %p326_p1, %p323_p0 }
   0x9   :  { %331 = shalt.err (!%p328_p2)
}
   0xa   :  { %s332_s20 = scalar_lea.vmem %s17_s10, 16  ;;  %s336_s21 = scalar_lea.vmem %s17_s10, 32 }
   0xb   :  { %p333_p3 = scmp.ne.s32.totalorder %s17_s10, %s332_s20  ;;  %p337_p4 = scmp.lt.s32.totalorder %s17_s10, %s17_s10 }
   0xc   :  { %p338_p5 = scmp.lt.s32.totalorder %s336_s21, %s332_s20 }
   0xe   :  { %p339_p6 = por %p338_p5, %p337_p4 }
  0x10   :  { %p340_p7 = pnand %p339_p6, %p333_p3 }
  0x12   :  { %343 = shalt.err (!%p340_p7)
}
  0x13   :  { %19 = dma.hbm_to_vmem [thread:$0]  %s480_s0, 16, %s17_s10, [#allocation3]  }
  0x14   :  { %s344_s26 = scalar_lea.hbm %s481_s1, 128 }
  0x15   :  { %p345_p8 = scmp.ne.s32.totalorder %s481_s1, %s344_s26  ;;  %p348_p9 = scmp.lt.u32.totalorder %s344_s26, %s481_s1 }
  0x17   :  { %p350_p10 = pnand %p348_p9, %p345_p8 }
  0x19   :  { %353 = shalt.err (!%p350_p10)
}
  0x1a   :  { %s354_s3 = scalar_lea.vmem %s27_s12, 128  ;;  %p359_p12 = scmp.lt.s32.totalorder %s27_s12, %s27_s12 }
  0x1b   :  { %p355_p11 = scmp.ne.s32.totalorder %s27_s12, %s354_s3  ;;  %p360_p13 = scmp.lt.s32.totalorder %s354_s3, %s354_s3 }
  0x1d   :  { %p361_p0 = por %p360_p13, %p359_p12 }
  0x1f   :  { %p362_p1 = pnand %p361_p0, %p355_p11 }
  0x21   :  { %365 = shalt.err (!%p362_p1)
}
  0x22   :  { %29 = dma.hbm_to_vmem [thread:$0]  %s481_s1, 128, %s27_s12, [#allocation6]  }
  0x23   :  { %388 = dma.done.wait [#allocation3], 16  }
  0x24   :  { %389 = vsyncadd [#allocation3], 4294967280 }
  0x25   :  { %390 = dma.done.wait [#allocation6], 128  }
  0x26   :  { %391 = vsyncadd [#allocation6], 4294967168  ;;  %v396_v0 = vmov 8   ;;  %v397_v1 = vmov 0   ;;  %v37_v2 = vld [vmem:[#allocation5] sm:$0xff]  ;;  %v398_v3 = vmov 25   ;;  %v61_v31 = vlaneseq }
  0x27   :  { %293 = vset.pattern.permute.xlu1 %v396_v0  ;;  %291 = vset.pattern.permute.xlu0 %v397_v1  ;;  %v399_v4 = vmov 24   ;;  %v400_v5 = vmov 9   ;;  %v401_v6 = vmov 10   ;;  %v402_v7 = vmov 11   ;;  %v38_v23 = vld [vmem:[#allocation5] sm:$0x1] }
  0x28   :  { %58 = vperm.xlu1 %293, %v37_v2   ;;  %41 = vperm.xlu0 %291, %v37_v2   ;;  %v403_v8 = vmov 13   ;;  %v404_v9 = vmov 12   ;;  %v405_v10 = vmov 16   ;;  %v406_v11 = vmov 14   ;;  %v265_v26 = vld [vmem:[#allocation2] ss:$0 sm:$0xff] }
  0x29   :  { %v407_v12 = vmov 18   ;;  %v408_v13 = vmov 15   ;;  %v409_v14 = vmov 21   ;;  %v410_v15 = vmov 26   ;;  %s418_s1 = smov [#allocation7]  }
  0x2a   :  { %v411_v16 = vmov 28   ;;  %v412_v17 = vmov 17   ;;  %v413_v18 = vmov 27   ;;  %v414_v19 = vmov 19   ;;  %s255_s5 = sshll.u32 %s418_s1, 4  ;;  %s256_s5 = int_to_ptr.vmem [resolvable:$true] %s255_s5 }
  0x2b   :  { %v415_v20 = vmov 20   ;;  %v416_v21 = vmov 22   ;;  %v417_v22 = vmov 23   ;;  %v458_v33 = vshrl.u32 %v61_v31, 7  ;;  %s366_s6 = scalar_lea.vmem %s256_s5, 16  ;;  %s370_s7 = scalar_lea.vmem %s256_s5, 32 }
  0x2c   :  { %294 = vset.pattern.permute.xlu1 %v398_v3  ;;  %292 = vset.pattern.permute.xlu0 %v399_v4  ;;  %p367_p2 = scmp.ne.s32.totalorder %s256_s5, %s366_s6  ;;  %p371_p3 = scmp.lt.s32.totalorder %s256_s5, %s256_s5 }
  0x2d   :  { %67 = vperm.xlu1 %294, %v37_v2   ;;  %52 = vperm.xlu0 %292, %v37_v2   ;;  %v63_v34 = vsub.s32 0, %v458_v33  ;;  %v77_v35 = vsub.s32 1, %v458_v33  ;;  %v87_v37 = vsub.s32 2, %v458_v33  ;;  %v97_v41 = vsub.s32 3, %v458_v33  ;;  %p372_p4 = scmp.lt.s32.totalorder %s370_s7, %s366_s6 }
  0x2e   :  { %v107_v45 = vsub.s32 4, %v458_v33  ;;  %v117_v50 = vsub.s32 5, %v458_v33  ;;  %v127_v58 = vsub.s32 6, %v458_v33  ;;  %v137_v62 = vsub.s32 7, %v458_v33 }
  0x2f   :  { %p373_p5 = por %p372_p4, %p371_p3 }
  0x31   :  { %295 = vset.pattern.permute.xlu1 %v400_v5  ;;  %296 = vset.pattern.permute.xlu0 %v401_v6  ;;  %p374_p6 = pnand %p373_p5, %p367_p2 }
  0x32   :  { %72 = vperm.xlu1 %295, %v37_v2   ;;  %82 = vperm.xlu0 %296, %v37_v2  }
  0x36   :  { %297 = vset.pattern.permute.xlu1 %v402_v7  ;;  %299 = vset.pattern.permute.xlu0 %v403_v8 }
  0x37   :  { %92 = vperm.xlu1 %297, %v37_v2   ;;  %112 = vperm.xlu0 %299, %v37_v2  }
  0x3b   :  { %298 = vset.pattern.permute.xlu1 %v404_v9  ;;  %302 = vset.pattern.permute.xlu0 %v405_v10 }
  0x3c   :  { %102 = vperm.xlu1 %298, %v37_v2   ;;  %143 = vperm.xlu0 %302, %v37_v2  }
  0x40   :  { %300 = vset.pattern.permute.xlu1 %v406_v11  ;;  %305 = vset.pattern.permute.xlu0 %v407_v12 }
  0x41   :  { %122 = vperm.xlu1 %300, %v37_v2   ;;  %167 = vperm.xlu0 %305, %v37_v2  }
  0x45   :  { %301 = vset.pattern.permute.xlu1 %v408_v13  ;;  %308 = vset.pattern.permute.xlu0 %v409_v14 }
  0x46   :  { %132 = vperm.xlu1 %301, %v37_v2   ;;  %197 = vperm.xlu0 %308, %v37_v2  }
  0x4a   :  { %303 = vset.pattern.permute.xlu1 %v410_v15  ;;  %311 = vset.pattern.permute.xlu0 %v411_v16 }
  0x4b   :  { %152 = vperm.xlu1 %303, %v37_v2   ;;  %228 = vperm.xlu0 %311, %v37_v2  }
  0x4f   :  { %304 = vset.pattern.permute.xlu1 %v412_v17  ;;  %313 = vset.pattern.permute.xlu0 %v413_v18 }
  0x50   :  { %157 = vperm.xlu1 %304, %v37_v2  }
  0x54   :  { %306 = vset.pattern.permute.xlu1 %v414_v19 }
  0x55   :  { %177 = vperm.xlu1 %306, %v37_v2  }
  0x59   :  { %307 = vset.pattern.permute.xlu1 %v415_v20 }
  0x5a   :  { %187 = vperm.xlu1 %307, %v37_v2  }
  0x5e   :  { %309 = vset.pattern.permute.xlu1 %v416_v21 }
  0x5f   :  { %207 = vperm.xlu1 %309, %v37_v2  }
  0x63   :  { %310 = vset.pattern.permute.xlu1 %v417_v22 }
  0x64   :  { %217 = vperm.xlu1 %310, %v37_v2  }
  0x68   :  { %312 = vset.pattern.permute.xlu1 %v413_v18 }
  0x69   :  { %240 = vperm.xlu1 %312, %v38_v23  }
  0xa7   :  { %v42_v24 = vpop.permute.xlu0 %41  ;;  %v59_v25 = vpop.permute.xlu1 %58 }
  0xa8   :  { %v50_v27 = vmul.f32 %v265_v26, %v42_v24 }
  0xac   :  { %v53_v28 = vpop.permute.xlu0 %52  ;;  %v68_v29 = vpop.permute.xlu1 %67 }
  0xad   :  { %v55_v30 = vadd.f32 %v53_v28, %v50_v27 }
  0xaf   :  { %314 = vtanh.f32 %v55_v30 }
  0xb1   :  { %v73_v32 = vpop.permute.xlu1 %72  ;;  %v83_v46 = vpop.permute.xlu0 %82 }
  0xb6   :  { %v93_v36 = vpop.permute.xlu1 %92  ;;  %v113_v59 = vpop.permute.xlu0 %112 }
  0xb9   :  { %v315_v38 = vpop.eup %314 }
  0xba   :  { %v64_v39 = vrot.slane %v315_v38, %v63_v34  ;;  %v78_v40 = vrot.slane %v315_v38, %v77_v35  ;;  %v88_v44 = vrot.slane %v315_v38, %v87_v37  ;;  %v98_v49 = vrot.slane %v315_v38, %v97_v41 }
  0xbb   :  { %v103_v42 = vpop.permute.xlu1 %102  ;;  %v108_v53 = vrot.slane %v315_v38, %v107_v45  ;;  %v118_v57 = vrot.slane %v315_v38, %v117_v50  ;;  %v128_v1 = vrot.slane %v315_v38, %v127_v58  ;;  %v138_v5 = vrot.slane %v315_v38, %v137_v62  ;;  %v144_v12 = vpop.permute.xlu0 %143 }
  0xbc   :  { %v65_v43 = vmul.f32 %v64_v39, %v59_v25  ;;  %v79_v48 = vmul.f32 %v78_v40, %v73_v32  ;;  %v89_v52 = vmul.f32 %v88_v44, %v83_v46  ;;  %v99_v55 = vmul.f32 %v98_v49, %v93_v36 }
  0xbd   :  { %v109_v61 = vmul.f32 %v108_v53, %v103_v42  ;;  %v119_v0 = vmul.f32 %v118_v57, %v113_v59 }
  0xbe   :  { %v70_v47 = vadd.f32 %v68_v29, %v65_v43 }
  0xc0   :  { %v80_v51 = vadd.f32 %v79_v48, %v70_v47  ;;  %v123_v54 = vpop.permute.xlu1 %122  ;;  %v168_v19 = vpop.permute.xlu0 %167 }
  0xc1   :  { %v129_v4 = vmul.f32 %v128_v1, %v123_v54 }
  0xc2   :  { %v90_v56 = vadd.f32 %v89_v52, %v80_v51 }
  0xc4   :  { %v100_v60 = vadd.f32 %v99_v55, %v90_v56 }
  0xc5   :  { %v133_v2 = vpop.permute.xlu1 %132  ;;  %v198_v30 = vpop.permute.xlu0 %197 }
  0xc6   :  { %v110_v63 = vadd.f32 %v109_v61, %v100_v60  ;;  %v139_v7 = vmul.f32 %v138_v5, %v133_v2 }
  0xc8   :  { %v120_v3 = vadd.f32 %v119_v0, %v110_v63 }
  0xca   :  { %v130_v6 = vadd.f32 %v129_v4, %v120_v3  ;;  %v153_v8 = vpop.permute.xlu1 %152  ;;  %v229_v43 = vpop.permute.xlu0 %228 }
  0xcc   :  { %v140_v9 = vadd.f32 %v139_v7, %v130_v6 }
  0xce   :  { %316 = vtanh.f32 %v140_v9 }
  0xcf   :  { %v158_v10 = vpop.permute.xlu1 %157 }
  0xd4   :  { %v178_v11 = vpop.permute.xlu1 %177 }
  0xd8   :  { %v317_v13 = vpop.eup %316 }
  0xd9   :  { %v163_v14 = vrot.slane %v317_v13, %v77_v35  ;;  %v149_v15 = vrot.slane %v317_v13, %v63_v34  ;;  %v188_v16 = vpop.permute.xlu1 %187  ;;  %v173_v18 = vrot.slane %v317_v13, %v87_v37  ;;  %v183_v22 = vrot.slane %v317_v13, %v97_v41 }
  0xda   :  { %v193_v25 = vrot.slane %v317_v13, %v107_v45  ;;  %v203_v29 = vrot.slane %v317_v13, %v117_v50  ;;  %v213_v34 = vrot.slane %v317_v13, %v127_v58  ;;  %v223_v39 = vrot.slane %v317_v13, %v137_v62 }
  0xdb   :  { %v150_v17 = vmul.f32 %v149_v15, %v144_v12  ;;  %v164_v20 = vmul.f32 %v163_v14, %v158_v10  ;;  %v174_v24 = vmul.f32 %v173_v18, %v168_v19  ;;  %v184_v27 = vmul.f32 %v183_v22, %v178_v11 }
  0xdc   :  { %v194_v32 = vmul.f32 %v193_v25, %v188_v16  ;;  %v204_v35 = vmul.f32 %v203_v29, %v198_v30 }
  0xdd   :  { %v155_v21 = vadd.f32 %v153_v8, %v150_v17 }
  0xde   :  { %v208_v26 = vpop.permute.xlu1 %207 }
  0xdf   :  { %v165_v23 = vadd.f32 %v164_v20, %v155_v21  ;;  %v214_v37 = vmul.f32 %v213_v34, %v208_v26 }
  0xe1   :  { %v175_v28 = vadd.f32 %v174_v24, %v165_v23 }
  0xe3   :  { %v185_v31 = vadd.f32 %v184_v27, %v175_v28  ;;  %v218_v36 = vpop.permute.xlu1 %217 }
  0xe4   :  { %v224_v42 = vmul.f32 %v223_v39, %v218_v36 }
  0xe5   :  { %v195_v33 = vadd.f32 %v194_v32, %v185_v31 }
  0xe7   :  { %v205_v38 = vadd.f32 %v204_v35, %v195_v33 }
  0xe8   :  { %v241_v51 = vpop.permute.xlu1 %240 }
  0xe9   :  { %v215_v40 = vadd.f32 %v214_v37, %v205_v38 }
  0xeb   :  { %v225_v41 = vadd.f32 %v224_v42, %v215_v40 }
  0xed   :  { %318 = vtanh.f32 %v225_v41 }
  0xf7   :  { %v319_v44 = vpop.eup %318 }
  0xf8   :  { %v231_v45 = vmul.f32 %v319_v44, %v229_v43 }
  0xfa   :  { %v232_v46 = vrot.slane %v231_v45, 4 }
  0xfc   :  { %v233_v47 = vadd.f32 %v232_v46, %v231_v45 }
  0xfe   :  { %v234_v48 = vrot.slane %v233_v47, 2 }
 0x100   :  { %v235_v49 = vadd.f32 %v234_v48, %v233_v47 }
 0x102   :  { %v236_v50 = vrot.slane %v235_v49, 1 }
 0x104   :  { %v237_v52 = vadd.f32 %v236_v50, %v235_v49 }
 0x106   :  { %v243_v53 = vadd.f32 %v241_v51, %v237_v52 }
 0x108   :  { %v244_v54 = vmul.f32 0.5, %v243_v53 }
 0x10a   :  { %320 = vtanh.f32 %v244_v54 }
 0x114   :  { %v321_v55 = vpop.eup %320 }
 0x115   :  { %v246_v56 = vmul.f32 0.5, %v321_v55 }
 0x117   :  { %v247_v57 = vadd.f32 0.5, %v246_v56 }
 0x119   :  { %248 = vst [vmem:[#allocation7] sm:$0x1] %v247_v57 }
 0x11a   :  { %377 = shalt.err (!%p374_p6)
}
 0x11b   :  { %s378_s10 = scalar_lea.hbm %s482_s2, 16 }
 0x11c   :  { %p379_p7 = scmp.ne.s32.totalorder %s482_s2, %s378_s10  ;;  %p382_p8 = scmp.lt.u32.totalorder %s378_s10, %s482_s2 }
 0x11e   :  { %p384_p9 = pnand %p382_p8, %p379_p7 }
 0x120   :  { %387 = shalt.err (!%p384_p9)
}
 0x121   :  { %258 = dma.vmem_to_hbm [thread:$0]  %s256_s5, 16, %s482_s2, [#allocation4]  }
 0x122   :  { %392 = dma.done.wait [#allocation4], 16  }
 0x123   :  { %393 = vsyncadd [#allocation4], 4294967280 }
 0x124   :  { %262 = vsyncpa [#allocation3], 1 }
 0x125   :  { %263 = vsyncpa [#allocation6], 1 }
 0x126   :  { %264 = vsyncpa [#allocation4], 1 }

</bundles_post_ra>
